<compile_context>
chip_gen: v6e
topology: v6e:2x2x1
jax: 0.10.0
libtpu: 0.0.40
codegen_flags: <defaults>
</compile_context>

<pallas_src>
import functools

import jax
import jax.numpy as jnp
from jax.experimental import pallas as pl
from jax.experimental.pallas import tpu as pltpu


def _round_up(x, m):
    return ((x + m - 1) // m) * m


def _mxu_is_256():
    """True on chips with 256x256 MXUs (v6e / v7x); False on 128x128 (<= v5)."""
    try:
        kind = jax.devices()[0].device_kind.lower()
    except Exception:
        return False
    return not any(v in kind for v in ("v2", "v3", "v4", "v5"))


def _pad_dim(d, *, align256):
    p = _round_up(d, 128)
    # On 256x256-MXU generations, bump dims that span more than one 128-tile
    # to a multiple of 256 so no half-empty systolic pass is issued (384->512).
    if align256 and d > 128 and p % 256 != 0:
        p = _round_up(d, 256)
    return p


def patch_embed_kernel(x_ref, w_ref, b_ref, o_ref):
    # x_ref: (TM, K_pad) bf16 patch tile (streamed over M)
    # w_ref: (K_pad, E_pad) bf16 projection weight (VMEM resident)
    # b_ref: (1, E_pad)  f32 bias (VMEM resident)
    # o_ref: (TM, E_pad) output tile (bf16 by default)
    acc = jnp.dot(x_ref[...], w_ref[...], preferred_element_type=jnp.float32)
    o_ref[...] = (acc + b_ref[...]).astype(o_ref.dtype)


def prepare_patch_embed_params(weight, bias):
    """One-time (cacheable) prep: Conv2d weight (E,C,P,P) -> (K_pad,E_pad) bf16,
    bias (E,) -> (1,E_pad) f32.  K flatten order is (c, ph, pw) — keep in sync
    with the patch extraction in patch_embed."""
    E, C, P, _ = weight.shape
    K = C * P * P
    align256 = _mxu_is_256()
    K_pad = _pad_dim(K, align256=align256)
    E_pad = _pad_dim(E, align256=align256)
    w = weight.reshape(E, K).T.astype(jnp.bfloat16)
    if (K_pad, E_pad) != (K, E):
        w = jnp.pad(w, ((0, K_pad - K), (0, E_pad - E)))
    b = bias.astype(jnp.float32).reshape(1, E)
    if E_pad != E:
        b = jnp.pad(b, ((0, 0), (0, E_pad - E)))
    return w, b


def patch_embed(x, w_mat, b_mat, patch_size, embed_dim, *, tm=1024,
                out_dtype=jnp.bfloat16):
    """x: (B,C,H,W); w_mat/b_mat from prepare_patch_embed_params.
    Returns (B, N, E) in out_dtype == PyTorch proj(x).flatten(2).transpose(1,2)."""
    B, C, H, W = x.shape
    P = patch_size
    E = embed_dim
    assert H % P == 0 and W % P == 0
    Hp, Wp = H // P, W // P
    N = Hp * Wp
    K = C * P * P
    M = B * N
    K_pad, E_pad = w_mat.shape

    # Patch extraction as one fused expression (reshape/transpose/cast); with
    # allow_input_fusion XLA may fold this producer into the kernel's input DMA.
    # Flatten order (c, ph, pw) matches prepare_patch_embed_params.
    x_mat = (x.reshape(B, C, Hp, P, Wp, P)
               .transpose(0, 2, 4, 1, 3, 5)
               .reshape(M, K)
               .astype(jnp.bfloat16))
    if K_pad != K:
        # Zero-pad K so the contraction ignores the pad region (rare for ViT).
        x_mat = jnp.pad(x_mat, ((0, 0), (0, K_pad - K)))

    # Tile over M; no M padding (Pallas masks the ragged last block's writes).
    TM = min(tm, _round_up(M, 8))
    if M > 8 and pl.cdiv(M, TM) < 2:
        # Ensure >= 2 grid steps so the "parallel" M axis can span both
        # TensorCores on v7x (negligible cost on single-TC chips).
        TM = _round_up(pl.cdiv(M, 2), 8)
    grid = (pl.cdiv(M, TM),)

    out_itemsize = jnp.dtype(out_dtype).itemsize
    cost = pl.CostEstimate(
        flops=2 * M * K_pad * E_pad,
        bytes_accessed=(M * K_pad * 2          # x (bf16)
                        + K_pad * E_pad * 2    # weight (bf16)
                        + E_pad * 4            # bias (f32)
                        + M * E_pad * out_itemsize),
        transcendentals=0,
    )

    # Double-buffered x/out streams + (double-buffered) resident weight + bias.
    vmem_est = (2 * TM * K_pad * 2 + 2 * TM * E_pad * out_itemsize
                + 2 * K_pad * E_pad * 2 + 2 * E_pad * 4)
    vmem_limit = min(64 * 1024 * 1024, max(int(1.5 * vmem_est), 32 * 1024 * 1024))

    # TODO(synk): single-buffer the constant-index weight/bias blocks
    # (pipeline_mode=pl.Buffered(1)) once verified, to free K_pad*E_pad*2 bytes
    # of VMEM headroom on v7x (64 MiB physical).
    out = pl.pallas_call(
        patch_embed_kernel,
        out_shape=jax.ShapeDtypeStruct((M, E_pad), out_dtype),
        grid=grid,
        in_specs=[
            pl.BlockSpec((TM, K_pad), lambda i: (i, 0)),     # x: streams over M
            pl.BlockSpec((K_pad, E_pad), lambda i: (0, 0)),  # weight: resident
            pl.BlockSpec((1, E_pad), lambda i: (0, 0)),      # bias: resident
        ],
        out_specs=pl.BlockSpec((TM, E_pad), lambda i: (i, 0)),
        compiler_params=pltpu.CompilerParams(
            dimension_semantics=("parallel",),
            allow_input_fusion=[True, False, False],
            vmem_limit_bytes=vmem_limit,
        ),
        cost_estimate=cost,
    )(x_mat, w_mat, b_mat)

    # Strip E padding only (no M padding exists), then (B*N, E) -> (B, N, E).
    out = out if E_pad == E else out[:, :E]
    return out.reshape(B, N, E)


if __name__ == "__main__":
    # Small shapes consistent with the module: B=2, C=4, H=W=16, P=8, E=32.
    B, C, H, W = 2, 4, 16, 16
    P, E = 8, 32

    key = jax.random.PRNGKey(0)
    kx, kw, kb = jax.random.split(key, 3)

    x = jax.random.normal(kx, (B, C, H, W), dtype=jnp.float32)
    # Deterministic synthetic parameters (same shapes as nn.Conv2d(C, E, P, P)).
    weight = jax.random.normal(kw, (E, C, P, P), dtype=jnp.float32) * 0.02
    bias = jax.random.normal(kb, (E,), dtype=jnp.float32) * 0.02

    # One-time weight prep (cache this outside the hot path in real use).
    w_mat, b_mat = prepare_patch_embed_params(weight, bias)

    fwd = jax.jit(functools.partial(patch_embed, patch_size=P, embed_dim=E))
    out = jax.block_until_ready(fwd(x, w_mat, b_mat))

    # Reference check with lax.conv (same semantics as the PyTorch forward), f32.
    ref = jax.lax.conv_general_dilated(
        x, weight, window_strides=(P, P), padding="VALID",
        dimension_numbers=("NCHW", "OIHW", "NCHW"),
    ) + bias.reshape(1, E, 1, 1)
    ref = jnp.transpose(ref.reshape(B, E, -1), (0, 2, 1))

    assert out.shape == (B, (H // P) * (W // P), E)
    # bf16 inputs/output with f32 accumulation -> loosened tolerance vs f32 conv.
    assert jnp.allclose(out.astype(jnp.float32), ref, atol=2e-2, rtol=2e-2)

    print("KERNEL_OK")
</pallas_src>

<mosaic_0001>
module attributes {stable_mosaic.version = 11 : i64} {
  func.func @patch_embed_kernel(%arg0: i32, %arg1: memref<8x256xbf16, #tpu.memory_space<vmem>>, %arg2: memref<256x128xbf16, #tpu.memory_space<vmem>>, %arg3: memref<1x128xf32, #tpu.memory_space<vmem>>, %arg4: memref<8x128xbf16, #tpu.memory_space<vmem>>) attributes {dimension_semantics = [#tpu.dimension_semantics<parallel>], iteration_bounds = array<i64: 1>, scalar_prefetch = 0 : i64, scratch_operands = 0 : i64, tpu.core_type = #tpu.core_type<tc>, window_params = [{transform_indices = @transform_0, window_bounds = array<i64: 8, 256>}, {pipeline_mode = #tpu.pipeline_mode<synchronous>, transform_indices = @transform_1, window_bounds = array<i64: 256, 128>}, {pipeline_mode = #tpu.pipeline_mode<synchronous>, transform_indices = @transform_2, window_bounds = array<i64: 1, 128>}, {transform_indices = @transform_3, window_bounds = array<i64: 8, 128>}]} {
    %c0 = arith.constant 0 : index
    %c0_0 = arith.constant 0 : index
    %0 = vector.load %arg1[%c0, %c0_0] : memref<8x256xbf16, #tpu.memory_space<vmem>>, vector<8x256xbf16>
    %c0_1 = arith.constant 0 : index
    %c0_2 = arith.constant 0 : index
    %1 = vector.load %arg2[%c0_1, %c0_2] : memref<256x128xbf16, #tpu.memory_space<vmem>>, vector<256x128xbf16>
    %cst = arith.constant dense<0.000000e+00> : vector<8x128xf32>
    %2 = tpu.matmul %0, %1, %cst {dimension_numbers = #tpu.dot_dimension_numbers<[1], [0], [0], [1], [0, 0, 1, 1], [], []>} : vector<8x256xbf16>, vector<256x128xbf16>, vector<8x128xf32> -> vector<8x128xf32>
    %c0_3 = arith.constant 0 : index
    %c0_4 = arith.constant 0 : index
    %3 = vector.load %arg3[%c0_3, %c0_4] : memref<1x128xf32, #tpu.memory_space<vmem>>, vector<1x128xf32>
    %4 = vector.broadcast %3 : vector<1x128xf32> to vector<8x128xf32>
    %5 = arith.addf %2, %4 : vector<8x128xf32>
    %6 = arith.truncf %5 : vector<8x128xf32> to vector<8x128xbf16>
    %c0_5 = arith.constant 0 : index
    %c0_6 = arith.constant 0 : index
    %7 = vector.load %arg4[%c0_5, %c0_6] : memref<8x128xbf16, #tpu.memory_space<vmem>>, vector<8x128xbf16>
    tpu.vector_store %arg4[%c0_5, %c0_6], %6 {strides = array<i32>} : memref<8x128xbf16, #tpu.memory_space<vmem>>, vector<8x128xbf16>,
    return
  }
  func.func @transform_0(%arg0: i32) -> (i32, i32) {
    %c0_i32 = arith.constant 0 : i32
    %c0_i32_0 = arith.constant 0 : i32
    return %arg0, %c0_i32 : i32, i32
  }
  func.func @transform_1(%arg0: i32) -> (i32, i32) {
    %c0_i32 = arith.constant 0 : i32
    %c0_i32_0 = arith.constant 0 : i32
    %c0_i32_1 = arith.constant 0 : i32
    return %c0_i32, %c0_i32_0 : i32, i32
  }
  func.func @transform_2(%arg0: i32) -> (i32, i32) {
    %c0_i32 = arith.constant 0 : i32
    %c0_i32_0 = arith.constant 0 : i32
    %c0_i32_1 = arith.constant 0 : i32
    return %c0_i32, %c0_i32_0 : i32, i32
  }
  func.func @transform_3(%arg0: i32) -> (i32, i32) {
    %c0_i32 = arith.constant 0 : i32
    %c0_i32_0 = arith.constant 0 : i32
    return %arg0, %c0_i32 : i32, i32
  }
}

</mosaic_0001>

<bundles_post_ra>
// kernel: patch_embed.1
= control target key start
LH: loop header
LB: loop body
LE: loop exit
PB: predicated region body
PF: predicated region fallthrough
CT: control target
= control target key end

     0   :  { %s375_s0 = inlined_call_operand.vmem [shape: bf16[8,256], index: 0, kind: input, shape index: {}]   ;;  %s376_s1 = inlined_call_operand.vmem [shape: bf16[256,128], index: 1, kind: input, shape index: {}]   ;;  %s377_s2 = inlined_call_operand.vmem [shape: f32[1,128], index: 2, kind: input, shape index: {}]   ;;  %s378_s3 = inlined_call_operand.hbm [shape: bf16[8,128], index: 3, kind: output, shape index: {}]  }
   0x1   :  { %v257_v0 = vld [vmem:[%s376_s1 + $0x78] sm:$0xff]   ;;  %v259_v2 = vld [vmem:[%s376_s1 + $0x70] sm:$0xff]   ;;  %v261_v4 = vld [vmem:[%s376_s1 + $0x68] sm:$0xff]  }
   0x2   :  { %v258_v1 = vld [vmem:[%s376_s1 + $0x38] sm:$0xff]   ;;  %234 = vmatprep.subr.bf16.mxu0 %v257_v0  ;;  %v260_v3 = vld [vmem:[%s376_s1 + $0x30] sm:$0xff]   ;;  %v262_v5 = vld [vmem:[%s376_s1 + $0x28] sm:$0xff]  }
   0x3   :  { %235 = vmatpush3.bf16.msra.mxu0 %v258_v1  ;;  %v263_v6 = vld [vmem:[%s376_s1 + $0x60] sm:$0xff]   ;;  %v265_v8 = vld [vmem:[%s376_s1 + $0x58] sm:$0xff]   ;;  %v267_v10 = vld [vmem:[%s376_s1 + $0x50] sm:$0xff]  }
   0x4   :  { %236 = vmatprep.subr.bf16.mxu0 %v259_v2  ;;  %v264_v7 = vld [vmem:[%s376_s1 + $0x20] sm:$0xff]   ;;  %v266_v9 = vld [vmem:[%s376_s1 + $0x18] sm:$0xff]  }
   0x5   :  { %v16_v11 = vld [vmem:[%s375_s0] sm:$0xff] }
   0x7   :  { %237 = vmatpush3.bf16.msra.mxu0 %v260_v3 }
   0x8   :  { %238 = vmatprep.subr.bf16.mxu0 %v261_v4 }
   0xb   :  { %239 = vmatpush3.bf16.msra.mxu0 %v262_v5 }
   0xc   :  { %240 = vmatprep.subr.bf16.mxu0 %v263_v6 }
   0xf   :  { %241 = vmatpush3.bf16.msra.mxu0 %v264_v7 }
  0x10   :  { %242 = vmatprep.subr.bf16.mxu0 %v265_v8 }
  0x11   :  { %8 = vsyncpa [#allocation3], 0  ;;  %v217_v12 = vcombine.high %v16_v11, %v16_v11  ;;  %v268_v13 = vld [vmem:[%s376_s1 + $0x10] sm:$0xff]   ;;  %v269_v14 = vld [vmem:[%s376_s1 + $0x48] sm:$0xff]   ;;  %v216_v18 = vcombine.low %v16_v11, %v16_v11  ;;  %s297_s20 = smov [#allocation2]  }
  0x12   :  { %v270_v15 = vld [vmem:[%s376_s1 + $0x8] sm:$0xff]   ;;  %v271_v16 = vld [vmem:[%s376_s1 + $0x40] sm:$0xff]   ;;  %s207_s21 = sshll.u32 %s297_s20, 4  ;;  %s208_s21 = int_to_ptr.vmem [resolvable:$true] %s207_s21 }
  0x13   :  { %243 = vmatpush3.bf16.msra.mxu0 %v266_v9  ;;  %191 = vmatprep.mubr.bf16.mxu0 %v217_v12  ;;  %v272_v17 = vld [vmem:[%s376_s1] sm:$0xff]   ;;  %s275_s1 = scalar_lea.vmem %s208_s21, 64  ;;  %p280_p1 = scmp.lt.s32.totalorder %s208_s21, %s208_s21 }
  0x14   :  { %244 = vmatprep.subr.bf16.mxu0 %v267_v10  ;;  %v215_v20 = vld [vmem:[%s377_s2] ss:$0 sm:$0xff]  ;;  %p276_p0 = scmp.ne.s32.totalorder %s208_s21, %s275_s1  ;;  %p281_p2 = scmp.lt.s32.totalorder %s275_s1, %s275_s1 }
  0x16   :  { %p282_p3 = por %p281_p2, %p280_p1 }
  0x17   :  { %245 = vmatpush3.bf16.msra.mxu0 %v268_v13 }
  0x18   :  { %246 = vmatprep.subr.bf16.mxu0 %v269_v14  ;;  %p283_p4 = pnand %p282_p3, %p276_p0 }
  0x1b   :  { %247 = vmatpush3.bf16.msra.mxu0 %v270_v15 }
  0x1c   :  { %248 = vmatprep.subr.bf16.mxu0 %v271_v16 }
  0x1f   :  { %249 = vmatpush3.bf16.msra.mxu0 %v272_v17 }
  0x22   :  { %192 = vmatmul.mubr.bf16.vlgmr.msra.gmra.mxu0 %v216_v18 }
  0xe2   :  { %v250_v19 = vpop.f32.mrf.mxu0 }
  0xe4   :  { %v251_v21 = vpop.f32.mrf.mxu0 }
  0xe5   :  { %v252_v22 = vadd.f32 %v251_v21, %v250_v19 }
  0xe6   :  { %v253_v23 = vpop.f32.mrf.mxu0 }
  0xe7   :  { %v194_v24 = vadd.f32 %v252_v22, %v215_v20 }
  0xe8   :  { %v254_v25 = vpop.f32.mrf.mxu0 }
  0xe9   :  { %v199_v26 = vpack.c.bf16 %v194_v24, %v194_v24 }
  0xeb   :  { %200 = vst [vmem:[#allocation2] sm:$0xf] %v199_v26 }
  0xec   :  { %286 = shalt.err (!%p283_p4)
}
  0xed   :  { %210 = dma.vmem_to_hbm [thread:$0]  %s208_s21, 64, %s378_s3, [#allocation3]  }
  0xee   :  { %295 = dma.done.wait [#allocation3], 64  }
  0xef   :  { %296 = vsyncadd [#allocation3], 4294967232 }
  0xf0   :  { %214 = vsyncpa [#allocation3], 1 }

</bundles_post_ra>
